<compile_context>
chip_gen: v7x
topology: tpu7x:2x2x1
jax: 0.10.0
libtpu: 0.0.40
codegen_flags: <defaults>
</compile_context>

<pallas_src>
import jax
import jax.numpy as jnp
from jax.experimental import pallas as pl
from jax.experimental.pallas import tpu as pltpu


def _conv1x1_sigmoid_kernel(w_ref, b_ref, x_ref, o_ref):
    # w_ref: (1, C) VMEM; b_ref: (1, 1) SMEM; x_ref: (1, C, TM) VMEM; o_ref: (1, 1, TM)
    y = jnp.dot(w_ref[...], x_ref[0], preferred_element_type=jnp.float32)  # (1, TM)
    y = y + b_ref[0, 0]
    # sigmoid via the EUP: exp + approximate reciprocal keep the VALU path free.
    e = jnp.exp(-y)
    o_ref[0] = pl.reciprocal(1.0 + e, approx=True)


def _pick_lane_tile(hw, n, cap=8192):
    """Largest lane tile that is a multiple of 128 (or the full spatial extent),
    capped so the double-buffered input stays ~4 MiB (fits the scoped-VMEM
    default on v5e/v6e/v7x), and reduced when the batch axis alone cannot
    provide >= 2 grid steps for v7x's two TensorCores."""
    if hw <= 128:
        return hw                                   # full-dim block is always legal
    tm = min(cap, (hw // 128) * 128)
    if n == 1 and pl.cdiv(hw, tm) < 2:
        tm = max(128, ((tm // 2) // 128) * 128)     # keep >= 2 spatial grid steps
    return tm


def decoder2mat_forward(x, weight, bias, *, tm=None):
    """x: (N, 64, H, W) f32; weight: (1, 64, 1, 1); bias: (1,). Returns (N, 1, H, W)."""
    N, C, H, W = x.shape
    HW = H * W
    M = N * HW

    # Glue (all free views / tiny params, no extra HBM pass over x):
    x_mat = x.reshape(N, C, HW)
    w_mat = weight.reshape(1, C).astype(jnp.float32)
    b_mat = bias.reshape(1, 1).astype(jnp.float32)

    if tm is None:
        tm = _pick_lane_tile(HW, N)
    grid = (N, pl.cdiv(HW, tm))   # tail block (if any) is masked by Pallas

    out = pl.pallas_call(
        _conv1x1_sigmoid_kernel,
        out_shape=jax.ShapeDtypeStruct((N, 1, HW), jnp.float32),
        grid_spec=pltpu.PrefetchScalarGridSpec(
            num_scalar_prefetch=0,
            grid=grid,
            in_specs=[
                pl.BlockSpec((1, C), lambda n, m: (0, 0)),                # weight (VMEM-resident)
                pl.BlockSpec(memory_space=pltpu.MemorySpace.SMEM),        # bias scalar
                pl.BlockSpec((1, C, tm), lambda n, m: (n, 0, m)),         # input tile (no transpose)
            ],
            out_specs=pl.BlockSpec((1, 1, tm), lambda n, m: (n, 0, m)),   # lane-dense output slab
        ),
        compiler_params=pltpu.CompilerParams(
            dimension_semantics=("parallel", "parallel"),
        ),
        cost_estimate=pl.CostEstimate(
            flops=2 * C * M,
            transcendentals=M,
            bytes_accessed=4 * (C * M + M + C + 1),
        ),
    )(w_mat, b_mat, x_mat)

    # Glue: (N, 1, HW) -> (N, 1, H, W) is a free reshape.
    return out.reshape(N, 1, H, W)


if __name__ == "__main__":
    key = jax.random.PRNGKey(0)
    k_x, k_w, k_b = jax.random.split(key, 3)

    N, C, H, W = 2, 64, 16, 16  # nn.Conv2d(64, 1, 1) fixes C=64
    x = jax.random.normal(k_x, (N, C, H, W), dtype=jnp.float32)

    # Deterministic synthetic parameters (shapes from nn.Conv2d(64, 1, 1)).
    fan_in = C  # 1x1 kernel
    bound = 1.0 / (fan_in ** 0.5)
    weight = jax.random.uniform(k_w, (1, C, 1, 1), jnp.float32, -bound, bound)
    bias = jax.random.uniform(k_b, (1,), jnp.float32, -bound, bound)

    out = decoder2mat_forward(x, weight, bias)
    out = jax.block_until_ready(out)

    # Plain-JAX reference for the same forward pass.
    ref = jax.nn.sigmoid(
        jnp.einsum("nchw,c->nhw", x, weight.reshape(C)) + bias[0]
    )[:, None, :, :]

    assert out.shape == (N, 1, H, W), out.shape
    # approx reciprocal (EUP vrcp) -> compare at a slightly relaxed tolerance.
    assert jnp.allclose(out, ref, atol=5e-3, rtol=5e-3), "mismatch vs reference"
    print("KERNEL_OK")
</pallas_src>

<mosaic_0001>
module attributes {stable_mosaic.version = 11 : i64} {
  func.func @_conv1x1_sigmoid_kernel(%arg0: i32, %arg1: i32, %arg2: memref<1x64xf32, #tpu.memory_space<vmem>>, %arg3: memref<1x1xf32, #tpu.memory_space<smem>>, %arg4: memref<1x64x256xf32, #tpu.memory_space<vmem>>, %arg5: memref<1x1x256xf32, #tpu.memory_space<vmem>>) attributes {dimension_semantics = [#tpu.dimension_semantics<parallel>, #tpu.dimension_semantics<parallel>], iteration_bounds = array<i64: 2, 1>, scalar_prefetch = 0 : i64, scratch_operands = 0 : i64, tpu.core_type = #tpu.core_type<tc>, window_params = [{pipeline_mode = #tpu.pipeline_mode<synchronous>, transform_indices = @transform_0, window_bounds = array<i64: 1, 64>}, {transform_indices = @transform_1, window_bounds = array<i64: 1, 1>}, {transform_indices = @transform_2, window_bounds = array<i64: 1, 64, 256>}, {transform_indices = @transform_3, window_bounds = array<i64: 1, 1, 256>}]} {
    %c0 = arith.constant 0 : index
    %c0_0 = arith.constant 0 : index
    %0 = vector.load %arg2[%c0, %c0_0] : memref<1x64xf32, #tpu.memory_space<vmem>>, vector<1x64xf32>
    %c0_1 = arith.constant 0 : index
    %c0_2 = arith.constant 0 : index
    %c0_3 = arith.constant 0 : index
    %1 = vector.load %arg4[%c0_1, %c0_2, %c0_3] : memref<1x64x256xf32, #tpu.memory_space<vmem>>, vector<1x64x256xf32>
    %2 = vector.shape_cast %1 : vector<1x64x256xf32> to vector<64x256xf32>
    %cst = arith.constant dense<0.000000e+00> : vector<1x256xf32>
    %3 = tpu.matmul %0, %2, %cst {dimension_numbers = #tpu.dot_dimension_numbers<[1], [0], [0], [1], [0, 0, 1, 1], [], []>} : vector<1x64xf32>, vector<64x256xf32>, vector<1x256xf32> -> vector<1x256xf32>
    %c0_4 = arith.constant 0 : index
    %c0_5 = arith.constant 0 : index
    %4 = memref.load %arg3[%c0_4, %c0_5] : memref<1x1xf32, #tpu.memory_space<smem>>
    %5 = vector.broadcast %4 : f32 to vector<1x256xf32>
    %6 = arith.addf %3, %5 : vector<1x256xf32>
    %cst_6 = arith.constant 0.000000e+00 : f32
    %7 = vector.broadcast %cst_6 : f32 to vector<1x256xf32>
    %8 = arith.subf %7, %6 : vector<1x256xf32>
    %9 = math.exp %8 : vector<1x256xf32>
    %cst_7 = arith.constant 1.000000e+00 : f32
    %10 = vector.broadcast %cst_7 : f32 to vector<1x256xf32>
    %11 = arith.addf %10, %9 : vector<1x256xf32>
    %12 = tpu.reciprocal %11 {approx = true} : vector<1x256xf32> -> vector<1x256xf32>
    %c0_8 = arith.constant 0 : index
    %c0_9 = arith.constant 0 : index
    %c0_10 = arith.constant 0 : index
    %13 = vector.load %arg5[%c0_8, %c0_9, %c0_10] : memref<1x1x256xf32, #tpu.memory_space<vmem>>, vector<1x1x256xf32>
    %14 = vector.shape_cast %13 : vector<1x1x256xf32> to vector<1x256xf32>
    %15 = vector.shape_cast %12 : vector<1x256xf32> to vector<1x1x256xf32>
    tpu.vector_store %arg5[%c0_8, %c0_9, %c0_10], %15 {strides = array<i32>} : memref<1x1x256xf32, #tpu.memory_space<vmem>>, vector<1x1x256xf32>,
    return
  }
  func.func @transform_0(%arg0: i32, %arg1: i32) -> (i32, i32) {
    %c0_i32 = arith.constant 0 : i32
    %c0_i32_0 = arith.constant 0 : i32
    %c0_i32_1 = arith.constant 0 : i32
    return %c0_i32, %c0_i32_0 : i32, i32
  }
  func.func @transform_1(%arg0: i32, %arg1: i32) -> (i32, i32) {
    %c0_i32 = arith.constant 0 : i32
    %c0_i32_0 = arith.constant 0 : i32
    %c0_i32_1 = arith.constant 0 : i32
    return %c0_i32, %c0_i32_0 : i32, i32
  }
  func.func @transform_2(%arg0: i32, %arg1: i32) -> (i32, i32, i32) {
    %c0_i32 = arith.constant 0 : i32
    %c0_i32_0 = arith.constant 0 : i32
    return %arg0, %c0_i32, %arg1 : i32, i32, i32
  }
  func.func @transform_3(%arg0: i32, %arg1: i32) -> (i32, i32, i32) {
    %c0_i32 = arith.constant 0 : i32
    %c0_i32_0 = arith.constant 0 : i32
    return %arg0, %c0_i32, %arg1 : i32, i32, i32
  }
}

</mosaic_0001>

<bundles_post_ra>
// kernel: tpu_custom_call.1
= control target key start
LH: loop header
LB: loop body
LE: loop exit
PB: predicated region body
PF: predicated region fallthrough
CT: control target
= control target key end

     0   :  { %s884_s0 = inlined_call_operand.vmem [shape: f32[1,64], index: 0, kind: input, shape index: {}]   ;;  %s885_s1 = inlined_call_operand.<no memory space> [shape: f32[1,1], index: 1, kind: input, shape index: {}]   ;;  %s886_s2 = inlined_call_operand.hbm [shape: f32[2,64,256], index: 2, kind: input, shape index: {}]   ;;  %s887_s3 = inlined_call_operand.hbm [shape: f32[2,1,256], index: 3, kind: output, shape index: {}]  }
   0x1   :  { %8 = sst [smem:[#allocation2]] %s885_s1 }
   0x2   :  { %9 = vsyncpa [#allocation4], 0 }
   0x3   :  { %11 = vsyncpa [#allocation4 + $0x1], 0 }
   0x4   :  { %12 = vsyncpa [#allocation5], 0 }
   0x5   :  { %14 = vsyncpa [#allocation5 + $0x1], 0  ;;  %s689_s14 = smov 0   ;;  %s691_s15 = smov 0  }
   0x6   :  { %s693_s16 = smov 0   ;;  %s695_s17 = smov 0  }
   0x7   :  { %s697_s18 = smov 0   ;;  %s699_s19 = smov 0  }
   0x8 LB: > { %s438_s1 = sadd.s32 4294967295, %s658_s19   ;;  %s439_s20 = sadd.s32 4294967294, %s658_s19   ;;  %s658_s19 = sphi %s699_s19, %s20_s19   ;;  %s654_s18 = sphi %s697_s18, %s902_s18   ;;  %s650_s17 = sphi %s695_s17, %s901_s17   ;;  %s646_s16 = sphi %s693_s16, %s900_s16   ;;  %s642_s15 = sphi %s691_s15, %s899_s15   ;;  %s638_s14 = sphi %s689_s14, %s898_s14  }
   0x9   : > { %s32_s21 = sadd.s32 1, %s654_s18  ;;  %s83_s22 = sadd.s32 1, %s646_s16 }
   0xa   : > { %p34_p0 = scmp.ge.s32.totalorder %s32_s21, 2  ;;  %p90_p1 = scmp.ne.s32.totalorder %s646_s16, %s642_s15 }
   0xb   : > { %p91_p2 = scmp.eq.s32.totalorder %s658_s19, 0  ;;  %p96_p3 = scmp.ne.s32.totalorder %s642_s15, %s638_s14 }
   0xc   : > { %s904_s21 = smov (%p34_p0, %s32_s21), 0  ;;  %p97_p5 = scmp.eq.s32.totalorder %s438_s1, 0 }
   0xd   : > { %p730_p4 = por %p91_p2, %p90_p1  ;;  %s78_s24 = ssub.s32 %s654_s18, %s904_s21 }
   0xe   : > { %p122_p6 = scmp.eq.s32.totalorder %s438_s1, 1  ;;  %p81_p7 = scmp.eq.s32.totalorder %s78_s24, 0 }
   0xf   : > { %p736_p8 = por %p97_p5, %p96_p3  ;;  %p128_p10 = scmp.eq.s32.totalorder %s439_s20, 1 }
  0x10   : > { %p740_p9 = por %p122_p6, %p90_p1  ;;  %p484_p13 = scmp.lt.s32.totalorder %s658_s19, 2 }
  0x11   : > { %s745_s27 = scalar_select %p81_p7, %s646_s16, %s83_s22  }
  0x12   : > { %s891_s26 = scalar_select %p740_p9, 1, 0 }
  0x13   : > { %p747_p11 = por %p128_p10, %p96_p3  ;;  %s154_s29 = sand.u32 1, %s646_s16  }
  0x14   : > { %s442_s30 = sshll.u32 %s154_s29, 7  ;;  %s454_s4 = sshll.u32 %s654_s18, 11 }
  0x15   : > { %s892_s28 = scalar_select %p747_p11, 1, 0 }
  0x16   : > { %s758_s7 = scalar_lea.hbm %s886_s2, %s454_s4  ;;  %s158_s8 = scalar_lea.vmem [#allocation3], %s442_s30 }
  0x17   : > { %s167_s9 = sshll.u32 %s158_s8, 4  ;;  %p764_p0 = pnand %p484_p13, %p730_p4  ;;  %s760_s9 = int_to_ptr.vmem [resolvable:$true] %s167_s9 }
  0x18   : > { %s769_s11 = scalar_lea.sflag [#allocation4], %s154_s29  ;;  %s546_s12 = scalar_lea.hbm %s758_s7, 2048 }
  0x19   : > { %p547_p2 = scmp.ne.s32.totalorder %s758_s7, %s546_s12  ;;  %p548_p3 = pneg %p764_p0 }
  0x1a   : > { %s551_s20 = scalar_lea.hbm %s886_s2, 4096  ;;  %p552_p4 = scmp.lt.u32.totalorder %s758_s7, %s886_s2 }
  0x1b   : > { %p549_p5 = pnand %p548_p3, %p547_p2  ;;  %p553_p7 = scmp.lt.u32.totalorder %s551_s20, %s546_s12 }
  0x1c   : > { %p555_p13 = scmp.lt.u32.totalorder %s546_s12, %s758_s7 }
  0x1d   : > { %p550_p6 = pneg %p549_p5  ;;  %p554_p10 = por %p553_p7, %p552_p4 }
  0x1f   : > { %p556_p12 = por %p555_p13, %p554_p10 }
  0x21   : > { %p557_p1 = pnand %p556_p12, %p550_p6 }
  0x23   : > { %560 = shalt.err (!%p557_p1)
}
  0x24   : > { %s561_s24 = scalar_lea.vmem %s760_s9, 2048  ;;  %s660_s29 = smov [#allocation3]  }
  0x25   : > { %p562_p2 = scmp.ne.s32.totalorder %s760_s9, %s561_s24  ;;  %s566_s30 = sshll.u32 %s660_s29, 4  ;;  %s567_s30 = int_to_ptr.vmem [resolvable:$false] %s566_s30 }
  0x26   : > { %s568_s4 = scalar_lea.vmem %s567_s30, 4096  ;;  %p569_p9 = scmp.lt.s32.totalorder %s760_s9, %s567_s30 }
  0x27   : > { %p564_p5 = pnand %p562_p2, %p548_p3  ;;  %p570_p4 = scmp.lt.s32.totalorder %s568_s4, %s561_s24 }
  0x29   : > { %p565_p11 = pneg %p564_p5  ;;  %p571_p7 = por %p570_p4, %p569_p9 }
  0x2b   : > { %p572_p10 = pnand %p571_p7, %p565_p11 }
  0x2d   : > { %575 = shalt.err (!%p572_p10)
}
  0x2e   : > { %s661_s5 = smov 256   ;;  %s662_s6 = smov 16  }
  0x2f   : > { %479 = dma.hbm_to_vmem [thread:$0]  (!%p764_p0), %s758_s7, 2048, %s760_s9, %s769_s11, %s661_s5, %s661_s5, %s662_s6  }
  0x30   : > { %p175_p12 = scmp.lt.s32.totalorder %s658_s19, 3  ;;  %p894_p1 = scmp.ge.s32.totalorder %s658_s19, 1 }
  0x32   : > { %p176_p3 = pnand %p894_p1, %p175_p12 }
  0x33   : > { %s801_s8 = sand.u32 (!%p176_p3), 1, %s642_s15  }
  0x34   : > { %179 = sbr.rel (%p176_p3) target bundleno = 342 (0x156), region = 32  ;;  %s446_s12 = sshll.u32 (!%p176_p3), %s801_s8, 7 }
  0x35   : > { %s182_s13 = scalar_lea.sflag (!%p176_p3), [#allocation4], %s801_s8  ;;  %s805_s1 = scalar_lea.vmem (!%p176_p3), [#allocation3], %s446_s12 }
  0x3b   : > { %629 = dma.done.wait (%p736_p8), %s182_s13, 2048  }
  0x3c   : > { %631 = vsyncadd (%p736_p8), %s182_s13, 4294965248  ;;  %v663_v0 = vmov 0.0   ;;  %v212_v1 = vld [vmem:[%s805_s1 + $0x8] sm:$0xff]  ;;  %v214_v2 = vld [vmem:[%s805_s1 + $0x18] sm:$0xff]  ;;  %vm229_vm0 = vcmask 523264   ;;  %s227_s9 = sld [smem:[#allocation2]]  ;;  %v320_v41 = vlaneseq }
  0x3d   : > { %297 = vmatprep.mubr.f32.mxu0 %v663_v0  ;;  %v211_v3 = vld [vmem:[%s805_s1] sm:$0xff]  ;;  %v456_v4 = vpack.c.bf16 %v214_v2, %v212_v1  ;;  %v213_v5 = vld [vmem:[%s805_s1 + $0x10] sm:$0xff]  ;;  %v216_v6 = vld [vmem:[%s805_s1 + $0x28] sm:$0xff]  ;;  %v664_v39 = vmov 1966171168   ;;  %s447_s10 = sshll.u32 %s801_s8, 1 }
  0x3e   : > { %v218_v7 = vld [vmem:[%s805_s1 + $0x38] sm:$0xff]  ;;  %v458_v8 = vpack.c.bf16 %v213_v5, %v211_v3  ;;  %v215_v10 = vld [vmem:[%s805_s1 + $0x20] sm:$0xff]  ;;  %v217_v11 = vld [vmem:[%s805_s1 + $0x30] sm:$0xff]  ;;  %v318_v40 = vunpack.c.l.s4 %v664_v39  ;;  %v321_v43 = vshrl.u32 %v320_v41, 7  ;;  %s455_s11 = sshll.u32 %s650_s17, 5  ;;  %s207_s20 = scalar_lea.vmem [#allocation6], %s447_s10 }
  0x3f   : > { %v460_v9 = vpack.c.bf16 %v218_v7, %v216_v6  ;;  %v220_v12 = vld [vmem:[%s805_s1 + $0x48] sm:$0xff]  ;;  %457 = vmatprep.subr.bf16.mxu0 %v456_v4  ;;  %v222_v13 = vld [vmem:[%s805_s1 + $0x58] sm:$0xff]  ;;  %v462_v14 = vpack.c.bf16 %v217_v11, %v215_v10  ;;  %v219_v16 = vld [vmem:[%s805_s1 + $0x40] sm:$0xff]  ;;  %s354_s22 = sshll.u32 %s207_s20, 4  ;;  %vm334_vm1 = vcmp.lt.s32.totalorder %v320_v41, 256  ;;  %s835_s29 = scalar_lea.hbm %s887_s3, %s455_s11  ;;  %s837_s22 = int_to_ptr.vmem [resolvable:$true] %s354_s22 }
  0x40   : > { %459 = vmatpush1.bf16.msra.mxu0 %v458_v8  ;;  %v464_v15 = vpack.c.bf16 %v222_v13, %v220_v12  ;;  %v221_v17 = vld [vmem:[%s805_s1 + $0x50] sm:$0xff]  ;;  %v224_v18 = vld [vmem:[%s805_s1 + $0x68] sm:$0xff]  ;;  %v226_v19 = vld [vmem:[%s805_s1 + $0x78] sm:$0xff]  ;;  %v319_v42 = vunpack.c.0.s8 %v318_v40  ;;  %s338_s30 = scalar_lea.sflag [#allocation5], %s801_s8  ;;  %s576_s4 = scalar_lea.vmem %s837_s22, 32 }
  0x41   : > { %461 = vmatprep.subr.bf16.mxu0 %v460_v9  ;;  %v466_v20 = vpack.c.bf16 %v221_v17, %v219_v16  ;;  %v468_v21 = vpack.c.bf16 %v226_v19, %v224_v18  ;;  %v223_v22 = vld [vmem:[%s805_s1 + $0x60] sm:$0xff]  ;;  %v225_v23 = vld [vmem:[%s805_s1 + $0x70] sm:$0xff]  ;;  %p577_p8 = scmp.ne.s32.totalorder %s837_s22, %s576_s4  ;;  %p895_p9 = scmp.ne.s32.totalorder %s891_s26, 0 }
  0x42   : > { %v470_v24 = vpack.c.bf16 %v225_v23, %v223_v22  ;;  %v210_v25 = vld [vmem:[%s884_s0] sm:$0x1]  ;;  %v228_v26 = vstv %s227_s9  ;;  %v322_v45 = vsub.s32 %v319_v42, %v321_v43  ;;  %s665_s17 = smov [#allocation6]  }
  0x43   : > { %p578_p11 = pnand %p577_p8, %p895_p9  ;;  %s580_s5 = sshll.u32 %s665_s17, 4  ;;  %s581_s5 = int_to_ptr.vmem [resolvable:$false] %s580_s5 }
  0x44   : > { %463 = vmatpush1.bf16.msra.mxu0 %v462_v14  ;;  %s582_s6 = scalar_lea.vmem %s581_s5, 64  ;;  %p583_p6 = scmp.lt.s32.totalorder %s837_s22, %s581_s5 }
  0x45   : > { %465 = vmatprep.subr.bf16.mxu0 %v464_v15  ;;  %p579_p0 = pneg %p578_p11  ;;  %p584_p13 = scmp.lt.s32.totalorder %s582_s6, %s576_s4 }
  0x47   : > { %p585_p2 = por %p584_p13, %p583_p6 }
  0x48   : > { %467 = vmatpush1.bf16.msra.mxu0 %v466_v20 }
  0x49   : > { %469 = vmatprep.subr.bf16.mxu0 %v468_v21  ;;  %p586_p5 = pnand %p585_p2, %p579_p0 }
  0x4c   : > { %471 = vmatpush1.bf16.msra.mxu0 %v470_v24 }
  0x4f   : > { %448 = vmatmul.mubr.msk.f32.vlgmr.msra.gmra.mrb[0].mxu0 %vm229_vm0, %v210_v25 }
 0x122   : > { %v299_v27 = vpop.f32.mrb[0].mxu0 }
 0x123   : > { %v300_v28 = vadd.f32 %v299_v27, %v228_v26  ;;  %v301_v29 = vpop.f32.mrb[1].mxu0 }
 0x124   : > { %v302_v30 = vadd.f32 %v301_v29, %v228_v26 }
 0x125   : > { %v304_v31 = vsub.f32 0.0, %v300_v28 }
 0x126   : > { %v305_v32 = vsub.f32 0.0, %v302_v30 }
 0x127   : > { %v306_v33 = vmul.f32 1.442695, %v304_v31 }
 0x128   : > { %v308_v34 = vmul.f32 1.442695, %v305_v32 }
 0x129   : > { %538 = vpow2.f32 %v306_v33 }
 0x12a   : > { %540 = vpow2.f32 %v308_v34 }
 0x133   : > { %v539_v35 = vpop.eup %538 }
 0x134   : > { %v541_v36 = vpop.eup %540  ;;  %v310_v37 = vadd.f32 1.0, %v539_v35 }
 0x135   : > { %v311_v38 = vadd.f32 1.0, %v541_v36 }
 0x136   : > { %542 = vrcp.f32 %v310_v37 }
 0x137   : > { %544 = vrcp.f32 %v311_v38 }
 0x140   : > { %v543_v44 = vpop.eup %542 }
 0x141   : > { %v545_v46 = vpop.eup %544 }
 0x142   : > { %v316_v47 = vcombine.low %v543_v44, %v545_v46 }
 0x144   : > { %v323_v48 = vrot.slane %v316_v47, %v322_v45 }
 0x146   : > { %v330_v49 = vrot.slane %v323_v48, %v322_v45 }
 0x148   : > { %336 = vst.msk [vmem:[%s207_s20] sm:$0x3] %vm334_vm1, %v330_v49 }
 0x149   : > { %589 = shalt.err (!%p586_p5)
}
 0x14a   : > { %s590_s8 = scalar_lea.hbm %s835_s29, 32  ;;  %s594_s1 = scalar_lea.hbm %s887_s3, 64 }
 0x14b   : > { %p591_p4 = scmp.ne.s32.totalorder %s835_s29, %s590_s8  ;;  %p595_p12 = scmp.lt.u32.totalorder %s835_s29, %s887_s3 }
 0x14c   : > { %p596_p1 = scmp.lt.u32.totalorder %s594_s1, %s590_s8  ;;  %p598_p8 = scmp.lt.u32.totalorder %s590_s8, %s835_s29 }
 0x14d   : > { %p592_p7 = pnand %p591_p4, %p895_p9 }
 0x14e   : > { %p597_p3 = por %p596_p1, %p595_p12 }
 0x14f   : > { %p593_p10 = pneg %p592_p7 }
 0x150   : > { %p599_p11 = por %p598_p8, %p597_p3 }
 0x152   : > { %p600_p0 = pnand %p599_p11, %p593_p10 }
 0x154   : > { %603 = shalt.err (!%p600_p0)
}
 0x155   : > { %474 = dma.vmem_to_hbm [thread:$0]  (%p895_p9), %s837_s22, 32, %s835_s29, %s338_s30  }
 0x156 PF: > { %s366_s9 = sand.u32 1, %s638_s14   ;;  %p896_p6 = scmp.ne.s32.totalorder %s892_s28, 0 }
 0x157   : > { %p897_p13 = scmp.ge.s32.totalorder %s658_s19, 2  ;;  %s367_s10 = scalar_lea.sflag [#allocation5], %s366_s9 }
 0x159   : > { %p481_p2 = pnand %p897_p13, %p896_p6 }
 0x15b   : > { %633 = dma.done.wait (!%p481_p2), %s367_s10, 32  }
 0x15c   : > { %635 = vsyncadd (!%p481_p2), %s367_s10, 4294967264  ;;  %s20_s19 = sadd.s32 1, %s658_s19   ;;  %s898_s14 = smov %s642_s15 }
 0x15d   : > { %p17_p5 = scmp.ge.s32.totalorder %s20_s19, 4   ;;  %s899_s15 = smov %s646_s16 }
 0x15e   : > { %s900_s16 = smov %s745_s27  ;;  %s901_s17 = smov %s654_s18 }
 0x15f   : > { %s902_s18 = smov %s904_s21  ;;  %19 = sbr.rel (!%p17_p5) target bundleno = 8 (0x8), region = 77 }
 0x166   :  { %372 = vsyncpa [#allocation4], 1 }
 0x167   :  { %374 = vsyncpa [#allocation4 + $0x1], 1 }
 0x168   :  { %375 = vsyncpa [#allocation5], 1 }
 0x169   :  { %377 = vsyncpa [#allocation5 + $0x1], 1 }

</bundles_post_ra>
